<compile_context>
chip_gen: v5e
topology: v5e:2x2
jax: 0.10.0
libtpu: 0.0.40
codegen_flags: <defaults>
</compile_context>

<pallas_src>
import jax
import jax.numpy as jnp
from jax import lax
from jax.experimental import pallas as pl
from jax.experimental.pallas import tpu as pltpu


# ----------------------------------------------------------------------------
# Padding / tiling helpers
# ----------------------------------------------------------------------------
_VMEM_BUDGET = 24 << 20   # keep each core's working set ~<=24 MiB (v7x: 64 MiB/TC)


def _round_up(x, m):
    return ((x + m - 1) // m) * m


def _pad_gate_cols(w_t, H, Hp):
    """w_t: (rows, 4H) -> (rows, 4Hp): each gate slab (i,f,g,o) zero-padded H->Hp."""
    if Hp == H:
        return w_t
    rows = w_t.shape[0]
    w4 = w_t.reshape(rows, 4, H)
    out = jnp.zeros((rows, 4, Hp), w_t.dtype).at[:, :, :H].set(w4)
    return out.reshape(rows, 4 * Hp)


def _pad_rows(w, rows_p):
    rows = w.shape[0]
    if rows_p == rows:
        return w
    return jnp.pad(w, ((0, rows_p - rows),) + ((0, 0),) * (w.ndim - 1))


def _choose_time_chunk(T, Bp, Hp, target=32, budget=_VMEM_BUDGET):
    """Largest Tc <= target dividing T whose double-buffered gx/out blocks fit budget."""
    fixed = 2 * (Hp * 4 * Hp * 2) + 2 * (2 * Bp * Hp * 4)      # whh dbl-buf + h/c scratch
    per_t = 2 * (Bp * 4 * Hp * 2) + 2 * (Bp * Hp * 2)          # gx + out blocks, dbl-buf
    tc_max = max(1, (budget - fixed) // per_t)
    tc_max = int(min(tc_max, target, T))
    for c in range(tc_max, 0, -1):
        if T % c == 0:
            return c
    return 1


def _choose_row_tile(N, Hin, G2, P, target=512, budget=_VMEM_BUDGET):
    """Largest row tile <= target, multiple of 8, dividing N, fitting the VMEM budget."""
    fixed = 2 * (P * Hin * G2 * 2 + G2 * 4)                    # weights + bias, dbl-buf
    per_r = 2 * (P * Hin * 2 + G2 * 2)                         # x + out rows, dbl-buf
    r_max = max(8, (budget - fixed) // per_r)
    r_max = int(min(r_max, target, N))
    for r in range(r_max, 7, -1):
        if N % r == 0 and r % 8 == 0:
            return r
    return N


def _vmem_limit(work_bytes):
    # explicit budget with headroom; never above v7x's 64 MiB physical VMEM
    return int(min(max(2 * work_bytes, 32 << 20), 64 << 20))


# ----------------------------------------------------------------------------
# Pallas kernels
# ----------------------------------------------------------------------------
def _proj_kernel(x_ref, w_ref, b_ref, o_ref):
    """One row tile of the fused input->gates projection (both directions at once).

    x_ref: (P, R, Hin)  bf16  input planes (P=1 for layer 0, P=2 for layers >= 1)
    w_ref: (P, Hin, 8Hp) bf16 W_ih^T, columns = [fwd i|f|g|o , bwd i|f|g|o] (padded)
    b_ref: (1, 8Hp)     f32   b_ih + b_hh for both directions (padded)
    o_ref: (R, 8Hp)     bf16  gate pre-activations (cast on store)
    """
    P = x_ref.shape[0]
    acc = jnp.dot(x_ref[0], w_ref[0], preferred_element_type=jnp.float32)
    for p in range(1, P):
        acc = acc + jnp.dot(x_ref[p], w_ref[p], preferred_element_type=jnp.float32)
    o_ref[...] = (acc + b_ref[...]).astype(o_ref.dtype)


def _bilstm_kernel(gx_ref, whh_t_ref, out_ref, h_ref, c_ref):
    """Fused bidirectional recurrence.  Grid = (direction, time-chunk).

    gx_ref   : (Tc, Bp, 4Hp) bf16  precomputed x@W_ih^T + b for this direction/chunk
    whh_t_ref: (Hp, 4Hp)     bf16  hidden->gates weight (transposed, padded)
    out_ref  : (Tc, Bp, Hp)  bf16  hidden states written at original time positions
    h_ref, c_ref : (2, Bp, Hp) f32 scratch, indexed by direction
    """
    Tc, Bp, _ = gx_ref.shape
    Hp = whh_t_ref.shape[0]
    d = pl.program_id(0)

    @pl.when(pl.program_id(1) == 0)
    def _():
        zero = jnp.zeros((Bp, Hp), jnp.float32)
        h_ref[d] = zero
        c_ref[d] = zero

    whh = whh_t_ref[...]                       # loop-invariant (Hp, 4Hp) bf16

    def run(order):
        h = h_ref[d]
        c = c_ref[d]
        for t in order:                        # static indices -> aligned vld/vst
            gates = gx_ref[t].astype(jnp.float32) + jnp.dot(
                h.astype(whh.dtype), whh, preferred_element_type=jnp.float32)
            # PyTorch gate order i, f, g, o; each slab is a whole 128-lane slice.
            i_g = jax.nn.sigmoid(gates[:, 0 * Hp:1 * Hp])
            f_g = jax.nn.sigmoid(gates[:, 1 * Hp:2 * Hp])
            g_g = jnp.tanh(gates[:, 2 * Hp:3 * Hp])
            o_g = jax.nn.sigmoid(gates[:, 3 * Hp:4 * Hp])
            c = f_g * c + i_g * g_g
            h = o_g * jnp.tanh(c)
            out_ref[t] = h.astype(out_ref.dtype)
        h_ref[d] = h
        c_ref[d] = c

    @pl.when(d == 0)
    def _():
        run(range(Tc))                         # forward walks the chunk 0 .. Tc-1

    @pl.when(d == 1)
    def _():
        run(range(Tc - 1, -1, -1))             # backward walks Tc-1 .. 0


def _fc_kernel(hf_ref, hb_ref, wt_ref, b_ref, o_ref):
    """Fused last-timestep gather + concat + Linear: logits = [hf, hb] @ W^T + b."""
    o_ref[...] = (
        jnp.dot(hf_ref[...], wt_ref[0], preferred_element_type=jnp.float32)
        + jnp.dot(hb_ref[...], wt_ref[1], preferred_element_type=jnp.float32)
        + b_ref[...]
    )


# ----------------------------------------------------------------------------
# pallas_call wrappers
# ----------------------------------------------------------------------------
def input_projection(x_parts, wih_t, bias):
    """x_parts: (P, N, Hin) bf16; wih_t: (P, Hin, 8Hp) bf16; bias: (1, 8Hp) f32.
    Returns (N, 8Hp) bf16: columns [0:4Hp] = fwd gate pre-acts, [4Hp:8Hp] = bwd."""
    P, N, Hin = x_parts.shape
    G2 = wih_t.shape[-1]
    R = _choose_row_tile(N, Hin, G2, P)
    work = 2 * (P * R * Hin * 2 + R * G2 * 2 + P * Hin * G2 * 2 + G2 * 4)
    cost = pl.CostEstimate(
        flops=int(2 * N * P * Hin * G2),
        transcendentals=0,
        bytes_accessed=int(P * N * Hin * 2 + (N // R) * P * Hin * G2 * 2 + N * G2 * 2),
    )
    return pl.pallas_call(
        _proj_kernel,
        out_shape=jax.ShapeDtypeStruct((N, G2), jnp.bfloat16),
        grid_spec=pltpu.PrefetchScalarGridSpec(
            num_scalar_prefetch=0,
            grid=(N // R,),
            in_specs=[
                pl.BlockSpec((P, R, Hin), lambda r: (0, r, 0)),
                pl.BlockSpec((P, Hin, G2), lambda r: (0, 0, 0)),
                pl.BlockSpec((1, G2), lambda r: (0, 0)),
            ],
            out_specs=pl.BlockSpec((R, G2), lambda r: (r, 0)),
        ),
        compiler_params=pltpu.CompilerParams(
            dimension_semantics=("parallel",),
            vmem_limit_bytes=_vmem_limit(work)),
        cost_estimate=cost,
    )(x_parts, wih_t, bias)


def bilstm_layer(gx, whh_t):
    """gx: (T, Bp, 8Hp) bf16 (fwd|bwd gate pre-acts); whh_t: (2, Hp, 4Hp) bf16.
    Returns (2, T, Bp, Hp) bf16 hidden states at the original time positions
    (matching nn.LSTM bidirectional output semantics)."""
    T, Bp, _ = gx.shape
    Hp = whh_t.shape[1]
    G = 4 * Hp
    Tc = _choose_time_chunk(T, Bp, Hp)
    nT = T // Tc

    def gx_map(d, j):
        # backward direction walks the time chunks in reverse; column block = direction
        return (jnp.where(d == 0, j, nT - 1 - j), 0, d)

    def out_map(d, j):
        return (d, jnp.where(d == 0, j, nT - 1 - j), 0, 0)

    work = 2 * (Tc * Bp * G * 2 + Tc * Bp * Hp * 2 + Hp * G * 2) + 2 * (2 * Bp * Hp * 4)
    cost = pl.CostEstimate(
        flops=int(2 * 2 * T * Bp * Hp * G + 2 * T * Bp * 10 * Hp),
        transcendentals=int(2 * T * Bp * 5 * Hp),
        bytes_accessed=int(T * Bp * 2 * G * 2 + 2 * T * Bp * Hp * 2 + 2 * nT * Hp * G * 2),
    )
    return pl.pallas_call(
        _bilstm_kernel,
        out_shape=jax.ShapeDtypeStruct((2, T, Bp, Hp), jnp.bfloat16),
        grid_spec=pltpu.PrefetchScalarGridSpec(
            num_scalar_prefetch=0,
            grid=(2, nT),
            in_specs=[
                pl.BlockSpec((Tc, Bp, G), gx_map),
                pl.BlockSpec((None, Hp, G), lambda d, j: (d, 0, 0)),
            ],
            out_specs=pl.BlockSpec((None, Tc, Bp, Hp), out_map),
            scratch_shapes=[
                pltpu.VMEM((2, Bp, Hp), jnp.float32),   # h per direction
                pltpu.VMEM((2, Bp, Hp), jnp.float32),   # c per direction
            ],
        ),
        compiler_params=pltpu.CompilerParams(
            dimension_semantics=("parallel", "arbitrary"),
            vmem_limit_bytes=_vmem_limit(work)),
        cost_estimate=cost,
    )(gx, whh_t)


def fc_head(out_all, fc_wt, fc_b):
    """out_all: (2, T, Bp, Hp) bf16; fc_wt: (2, Hp, O) bf16; fc_b: (1, O) f32.
    Gathers the two last-timestep (Bp,Hp) blocks directly via BlockSpec index maps."""
    _, T, Bp, Hp = out_all.shape
    O = fc_wt.shape[-1]
    return pl.pallas_call(
        _fc_kernel,
        out_shape=jax.ShapeDtypeStruct((Bp, O), jnp.float32),
        grid_spec=pltpu.PrefetchScalarGridSpec(
            num_scalar_prefetch=0,
            grid=(1,),
            in_specs=[
                pl.BlockSpec((None, None, Bp, Hp), lambda i: (0, T - 1, 0, 0)),
                pl.BlockSpec((None, None, Bp, Hp), lambda i: (1, T - 1, 0, 0)),
                pl.BlockSpec((2, Hp, O), lambda i: (0, 0, 0)),
                pl.BlockSpec((1, O), lambda i: (0, 0)),
            ],
            out_specs=pl.BlockSpec((Bp, O), lambda i: (0, 0)),
        ),
    )(out_all, out_all, fc_wt, fc_b)


# ----------------------------------------------------------------------------
# Parameter preparation (done once, outside the steady-state forward path)
# ----------------------------------------------------------------------------
def prepare_params(params):
    H = params["lstm"][0]["fwd"][1].shape[1]
    Hp = _round_up(H, 128)
    prepared = {"layers": [], "H": H, "Hp": Hp}
    for li, lp in enumerate(params["lstm"]):
        d_in = lp["fwd"][0].shape[1]           # input_size (layer 0) or 2H
        P = 1 if li == 0 else 2                # layers >= 1 consume the 2 direction planes
        hin = d_in // P                        # per-input-plane width
        hin_p = hin if li == 0 else Hp         # layer-0 input width stays unpadded

        wih_parts = []                         # P x (hin_p, 8Hp): [fwd gates | bwd gates]
        for p in range(P):
            per_dir = []
            for dname in ("fwd", "bwd"):
                w_ih = lp[dname][0]                                  # (4H, d_in)
                w_p = w_ih[:, p * hin:(p + 1) * hin].T               # (hin, 4H)
                w_p = _pad_rows(_pad_gate_cols(w_p, H, Hp), hin_p)   # (hin_p, 4Hp)
                per_dir.append(w_p)
            wih_parts.append(jnp.concatenate(per_dir, axis=1))       # (hin_p, 8Hp)
        wih_t = jnp.stack(wih_parts, axis=0).astype(jnp.bfloat16)    # (P, hin_p, 8Hp)

        whh_t, bias = [], []
        for dname in ("fwd", "bwd"):
            _, w_hh, b_ih, b_hh = lp[dname]
            whh_t.append(_pad_rows(_pad_gate_cols(w_hh.T, H, Hp), Hp))       # (Hp, 4Hp)
            bias.append(_pad_gate_cols((b_ih + b_hh).reshape(1, 4 * H), H, Hp))
        prepared["layers"].append({
            "wih_t": wih_t,                                               # bf16
            "whh_t": jnp.stack(whh_t, 0).astype(jnp.bfloat16),            # (2, Hp, 4Hp)
            "bias": jnp.concatenate(bias, axis=1).astype(jnp.float32),    # (1, 8Hp)
        })
    O = params["fc_b"].shape[0]
    fc_w = params["fc_w"]                                                 # (O, 2H)
    fc_wt = jnp.stack([_pad_rows(fc_w[:, :H].T, Hp),
                       _pad_rows(fc_w[:, H:].T, Hp)], axis=0)             # (2, Hp, O)
    prepared["fc_wt"] = fc_wt.astype(jnp.bfloat16)
    prepared["fc_b"] = params["fc_b"].reshape(1, O).astype(jnp.float32)
    return prepared


# ----------------------------------------------------------------------------
# Forward pass matching LSTMClassifier.forward
# ----------------------------------------------------------------------------
def lstm_classifier_forward(x_btd, prepared):
    """x_btd: (B, T, input_size) f32 -> (B, output_size) f32."""
    B, T, D = x_btd.shape
    Hp = prepared["Hp"]
    Bp = _round_up(B, 8)
    x = jnp.transpose(x_btd, (1, 0, 2))                       # (T, B, D) time-major
    if Bp != B:
        x = jnp.pad(x, ((0, 0), (0, Bp - B), (0, 0)))         # zero-pad batch rows
    x_parts = x.reshape(1, T * Bp, D).astype(jnp.bfloat16)
    out_all = None
    for layer in prepared["layers"]:
        gx = input_projection(x_parts, layer["wih_t"], layer["bias"])   # (T*Bp, 8Hp) bf16
        gx = gx.reshape(T, Bp, 8 * Hp)                                  # trivial reshape
        out_all = bilstm_layer(gx, layer["whh_t"])                      # (2, T, Bp, Hp)
        # next layer consumes the fwd/bwd planes directly -> no (T,B,2H) concat in HBM
        x_parts = out_all.reshape(2, T * Bp, Hp)
    logits = fc_head(out_all, prepared["fc_wt"], prepared["fc_b"])      # (Bp, O) f32
    return logits[:B]


# ----------------------------------------------------------------------------
# Pure-JAX f32 reference (matches PyTorch semantics)
# ----------------------------------------------------------------------------
def _ref_cell(x_t, h, c, w_ih, w_hh, b_ih, b_hh):
    H = w_hh.shape[1]
    g = x_t @ w_ih.T + h @ w_hh.T + b_ih + b_hh
    i = jax.nn.sigmoid(g[:, :H])
    f = jax.nn.sigmoid(g[:, H:2 * H])
    gg = jnp.tanh(g[:, 2 * H:3 * H])
    o = jax.nn.sigmoid(g[:, 3 * H:])
    c = f * c + i * gg
    h = o * jnp.tanh(c)
    return h, c


def reference_forward(x_btd, params):
    B, T, _ = x_btd.shape
    x = jnp.transpose(x_btd, (1, 0, 2))  # (T, B, D)
    layer_in = x
    out_f = out_b = None
    for lp in params["lstm"]:
        H = lp["fwd"][1].shape[1]
        h = jnp.zeros((B, H)); c = jnp.zeros((B, H)); outs = []
        for t in range(T):
            h, c = _ref_cell(layer_in[t], h, c, *lp["fwd"])
            outs.append(h)
        out_f = jnp.stack(outs, axis=0)
        h = jnp.zeros((B, H)); c = jnp.zeros((B, H)); outs = [None] * T
        for t in range(T - 1, -1, -1):
            h, c = _ref_cell(layer_in[t], h, c, *lp["bwd"])
            outs[t] = h
        out_b = jnp.stack(outs, axis=0)
        layer_in = jnp.concatenate([out_f, out_b], axis=-1)
    last = jnp.concatenate([out_f[-1], out_b[-1]], axis=-1)
    return last @ params["fc_w"].T + params["fc_b"]


# ----------------------------------------------------------------------------
# Parameter init (deterministic, PyTorch-like scale)
# ----------------------------------------------------------------------------
def init_params(key, input_size, hidden_size, num_layers, output_size):
    bound = 1.0 / jnp.sqrt(hidden_size)
    params = {"lstm": []}
    for layer in range(num_layers):
        d_in = input_size if layer == 0 else 2 * hidden_size
        lp = {}
        for dname in ("fwd", "bwd"):
            key, k1, k2, k3, k4 = jax.random.split(key, 5)
            w_ih = jax.random.uniform(k1, (4 * hidden_size, d_in), jnp.float32, -bound, bound)
            w_hh = jax.random.uniform(k2, (4 * hidden_size, hidden_size), jnp.float32, -bound, bound)
            b_ih = jax.random.uniform(k3, (4 * hidden_size,), jnp.float32, -bound, bound)
            b_hh = jax.random.uniform(k4, (4 * hidden_size,), jnp.float32, -bound, bound)
            lp[dname] = (w_ih, w_hh, b_ih, b_hh)
        params["lstm"].append(lp)
    key, k1, k2 = jax.random.split(key, 3)
    fb = 1.0 / jnp.sqrt(2 * hidden_size)
    params["fc_w"] = jax.random.uniform(k1, (output_size, 2 * hidden_size), jnp.float32, -fb, fb)
    params["fc_b"] = jax.random.uniform(k2, (output_size,), jnp.float32, -fb, fb)
    return params


# ----------------------------------------------------------------------------
if __name__ == "__main__":
    def check(B, T, input_size, hidden_size, num_layers, output_size):
        key = jax.random.PRNGKey(0)
        key, kx = jax.random.split(key)
        x = jax.random.normal(kx, (B, T, input_size), jnp.float32)
        params = init_params(key, input_size, hidden_size, num_layers, output_size)
        prepared = prepare_params(params)
        out = jax.block_until_ready(lstm_classifier_forward(x, prepared))
        ref = jax.block_until_ready(reference_forward(x, params))
        assert out.shape == (B, output_size), out.shape
        # bf16 matmul inputs / bf16 gx (f32 accumulation, f32 recurrent state)
        assert jnp.allclose(out, ref, atol=5e-2, rtol=5e-2), (out, ref)

    # small / misaligned config matching the module defaults (exercises the padding path)
    check(B=2, T=8, input_size=16, hidden_size=32, num_layers=2, output_size=4)
    # lane/sublane-aligned config (no padding; validates numerics at aligned shapes)
    check(B=8, T=16, input_size=32, hidden_size=128, num_layers=1, output_size=8)

    print("KERNEL_OK")
</pallas_src>

<mosaic_0001>
module attributes {stable_mosaic.version = 11 : i64} {
  func.func @_proj_kernel(%arg0: i32, %arg1: memref<1x64x16xbf16, #tpu.memory_space<vmem>>, %arg2: memref<1x16x1024xbf16, #tpu.memory_space<vmem>>, %arg3: memref<1x1024xf32, #tpu.memory_space<vmem>>, %arg4: memref<64x1024xbf16, #tpu.memory_space<vmem>>) attributes {dimension_semantics = [#tpu.dimension_semantics<parallel>], iteration_bounds = array<i64: 1>, scalar_prefetch = 0 : i64, scratch_operands = 0 : i64, tpu.core_type = #tpu.core_type<tc>, window_params = [{transform_indices = @transform_0, window_bounds = array<i64: 1, 64, 16>}, {pipeline_mode = #tpu.pipeline_mode<synchronous>, transform_indices = @transform_1, window_bounds = array<i64: 1, 16, 1024>}, {pipeline_mode = #tpu.pipeline_mode<synchronous>, transform_indices = @transform_2, window_bounds = array<i64: 1, 1024>}, {transform_indices = @transform_3, window_bounds = array<i64: 64, 1024>}]} {
    %c0 = arith.constant 0 : index
    %c0_0 = arith.constant 0 : index
    %c0_1 = arith.constant 0 : index
    %0 = vector.load %arg1[%c0, %c0_0, %c0_1] : memref<1x64x16xbf16, #tpu.memory_space<vmem>>, vector<1x64x16xbf16>
    %1 = vector.shape_cast %0 : vector<1x64x16xbf16> to vector<64x16xbf16>
    %c0_2 = arith.constant 0 : index
    %c0_3 = arith.constant 0 : index
    %c0_4 = arith.constant 0 : index
    %2 = vector.load %arg2[%c0_2, %c0_3, %c0_4] : memref<1x16x1024xbf16, #tpu.memory_space<vmem>>, vector<1x16x1024xbf16>
    %3 = vector.shape_cast %2 : vector<1x16x1024xbf16> to vector<16x1024xbf16>
    %cst = arith.constant dense<0.000000e+00> : vector<64x1024xf32>
    %4 = tpu.matmul %1, %3, %cst {dimension_numbers = #tpu.dot_dimension_numbers<[1], [0], [0], [1], [0, 0, 1, 1], [], []>} : vector<64x16xbf16>, vector<16x1024xbf16>, vector<64x1024xf32> -> vector<64x1024xf32>
    %c0_5 = arith.constant 0 : index
    %c0_6 = arith.constant 0 : index
    %5 = vector.load %arg3[%c0_5, %c0_6] : memref<1x1024xf32, #tpu.memory_space<vmem>>, vector<1x1024xf32>
    %6 = vector.broadcast %5 : vector<1x1024xf32> to vector<64x1024xf32>
    %7 = arith.addf %4, %6 : vector<64x1024xf32>
    %8 = arith.truncf %7 : vector<64x1024xf32> to vector<64x1024xbf16>
    %c0_7 = arith.constant 0 : index
    %c0_8 = arith.constant 0 : index
    %9 = vector.load %arg4[%c0_7, %c0_8] : memref<64x1024xbf16, #tpu.memory_space<vmem>>, vector<64x1024xbf16>
    tpu.vector_store %arg4[%c0_7, %c0_8], %8 {strides = array<i32>} : memref<64x1024xbf16, #tpu.memory_space<vmem>>, vector<64x1024xbf16>,
    return
  }
  func.func @transform_0(%arg0: i32) -> (i32, i32, i32) {
    %c0_i32 = arith.constant 0 : i32
    %c0_i32_0 = arith.constant 0 : i32
    %c0_i32_1 = arith.constant 0 : i32
    return %c0_i32, %arg0, %c0_i32_0 : i32, i32, i32
  }
  func.func @transform_1(%arg0: i32) -> (i32, i32, i32) {
    %c0_i32 = arith.constant 0 : i32
    %c0_i32_0 = arith.constant 0 : i32
    %c0_i32_1 = arith.constant 0 : i32
    %c0_i32_2 = arith.constant 0 : i32
    return %c0_i32, %c0_i32_0, %c0_i32_1 : i32, i32, i32
  }
  func.func @transform_2(%arg0: i32) -> (i32, i32) {
    %c0_i32 = arith.constant 0 : i32
    %c0_i32_0 = arith.constant 0 : i32
    %c0_i32_1 = arith.constant 0 : i32
    return %c0_i32, %c0_i32_0 : i32, i32
  }
  func.func @transform_3(%arg0: i32) -> (i32, i32) {
    %c0_i32 = arith.constant 0 : i32
    %c0_i32_0 = arith.constant 0 : i32
    return %arg0, %c0_i32 : i32, i32
  }
}

</mosaic_0001>

<bundles_post_ra>
// kernel: tpu_custom_call.1
= control target key start
LH: loop header
LB: loop body
LE: loop exit
PB: predicated region body
PF: predicated region fallthrough
CT: control target
= control target key end

     0   :  { %8 = vsyncpa [#allocation3], 0  ;;  %s775_s0 = inlined_call_operand.vmem [shape: bf16[1,64,16], index: 0, kind: input, shape index: {}]   ;;  %s776_s1 = inlined_call_operand.hbm [shape: bf16[1,16,1024], index: 1, kind: input, shape index: {}]   ;;  %s777_s2 = inlined_call_operand.vmem [shape: f32[1,1024], index: 2, kind: input, shape index: {}]   ;;  %s778_s3 = inlined_call_operand.hbm [shape: bf16[64,1024], index: 3, kind: output, shape index: {}]  }
   0x1   :  { %9 = vsyncpa [#allocation4], 0  ;;  %s16_s14 = sshll.u32 %s776_s1, 4  ;;  %s602_s15 = smov [#allocation2]   ;;  %s17_s14 = int_to_ptr.hbm [resolvable:$true] %s16_s14 }
   0x2   :  { %s18_s16 = sshll.u32 %s602_s15, 4  ;;  %s603_s17 = smov 512   ;;  %s19_s16 = int_to_ptr.vmem [resolvable:$true] %s18_s16 }
   0x3   :  { %s604_s18 = smov 32  }
   0x4   :  { %24 = dma.hbm_to_vmem [thread:$0]  %s17_s14, 1024, %s19_s16, [#allocation3], %s603_s17, %s603_s17, %s604_s18  }
   0x5   :  { %598 = dma.done.wait [#allocation3], 1024  }
   0x6   :  { %599 = vsyncadd [#allocation3], 4294966272  ;;  %v472_v0 = vld [vmem:[#allocation2] sm:$0xf]  ;;  %v538_v2 = vld [vmem:[#allocation2 + $0x4] sm:$0xf] }
   0x7   :  { %v542_v1 = vld [vmem:[#allocation2 + $0x1c] sm:$0xf0]  ;;  %v474_v4 = vld [vmem:[#allocation2 + $0x20] sm:$0xf0]  ;;  %v480_v5 = vld [vmem:[#allocation2 + $0x8] sm:$0xf] }
   0x8   :  { %v473_v3 = vor.u32 %v542_v1, %v472_v0  ;;  %v543_v6 = vld [vmem:[#allocation2 + $0x24] sm:$0xf0]  ;;  %v477_v7 = vor.u32 %v538_v2, %v474_v4  ;;  %v539_v9 = vld [vmem:[#allocation2 + $0xc] sm:$0xf]  ;;  %v534_v11 = vld [vmem:[%s775_s0] sm:$0xff]  ;;  %vm126_vm0 = vcmask 130048  }
   0x9   :  { %v481_v8 = vor.u32 %v543_v6, %v480_v5  ;;  %v482_v10 = vld [vmem:[#allocation2 + $0x28] sm:$0xf0]  ;;  %v496_v13 = vld [vmem:[#allocation2 + $0x18] sm:$0xf]  ;;  %v541_v15 = vld [vmem:[#allocation2 + $0x1c] sm:$0xf] }
   0xa   :  { %146 = vmatpush.bf16.msra.mxu0 %v473_v3  ;;  %v485_v12 = vor.u32 %v539_v9, %v482_v10  ;;  %v545_v14 = vld [vmem:[#allocation2 + $0x34] sm:$0xf0]  ;;  %175 = vmatpush.bf16.msra.mxu1 %v477_v7  ;;  %v498_v17 = vld [vmem:[#allocation2 + $0x38] sm:$0xf0]  ;;  %v488_v18 = vld [vmem:[#allocation2 + $0x10] sm:$0xf] }
   0xb   :  { %204 = vmatpush.bf16.msra.mxu2 %v481_v8  ;;  %v497_v16 = vor.u32 %v545_v14, %v496_v13  ;;  %v544_v19 = vld [vmem:[#allocation2 + $0x2c] sm:$0xf0]  ;;  %v501_v20 = vor.u32 %v541_v15, %v498_v17  ;;  %v540_v22 = vld [vmem:[#allocation2 + $0x14] sm:$0xf]  ;;  %v535_v25 = vld [vmem:[%s775_s0 + $0x8] sm:$0xff]  ;;  %s441_s30 = sshll.u32 %s778_s3, 4  ;;  %s442_s30 = int_to_ptr.hbm [resolvable:$true] %s441_s30 }
   0xc   :  { %233 = vmatpush.bf16.msra.mxu3 %v485_v12  ;;  %v489_v21 = vor.u32 %v544_v19, %v488_v18  ;;  %v490_v23 = vld [vmem:[#allocation2 + $0x30] sm:$0xf0]  ;;  %v537_v27 = vld [vmem:[%s775_s0 + $0x18] sm:$0xff]  ;;  %v679_v28 = vld [vmem:[%s777_s2] sm:$0xff]  ;;  %s605_s2 = smov [#allocation5]  }
   0xd   :  { %502 = vmatmul.msk.bf16.vlgmr.msra.gmra.mxu0 %vm126_vm0, %v534_v11  ;;  %v493_v24 = vor.u32 %v540_v22, %v490_v23  ;;  %506 = vmatmul.msk.bf16.vlgmr.msra.gmra.mxu1 %vm126_vm0, %v534_v11  ;;  %v536_v26 = vld [vmem:[%s775_s0 + $0x10] sm:$0xff]  ;;  %v682_v29 = vperm.slane %v679_v28, 0  ;;  %v685_v30 = vperm.slane %v679_v28, 1  ;;  %v690_v36 = vperm.slane %v679_v28, 2  ;;  %s439_s27 = sshll.u32 %s605_s2, 4  ;;  %s440_s27 = int_to_ptr.vmem [resolvable:$true] %s439_s27 }
   0xe   :  { %510 = vmatmul.msk.bf16.vlgmr.msra.gmra.mxu2 %vm126_vm0, %v534_v11  ;;  %262 = vmatpush.bf16.msrb.mxu0 %v489_v21  ;;  %v693_v37 = vperm.slane %v679_v28, 3 }
   0xf   :  { %320 = vmatpush.bf16.msrb.mxu2 %v497_v16  ;;  %514 = vmatmul.msk.bf16.vlgmr.msra.gmra.mxu3 %vm126_vm0, %v534_v11 }
  0x10   :  { %349 = vmatpush.bf16.msrb.mxu3 %v501_v20  ;;  %291 = vmatpush.bf16.msrb.mxu1 %v493_v24 }
  0x1d   :  { %503 = vmatmul.msk.bf16.gmra.mxu0 %vm126_vm0, %v535_v25  ;;  %507 = vmatmul.msk.bf16.gmra.mxu1 %vm126_vm0, %v535_v25 }
  0x1e   :  { %511 = vmatmul.msk.bf16.gmra.mxu2 %vm126_vm0, %v535_v25 }
  0x1f   :  { %515 = vmatmul.msk.bf16.gmra.mxu3 %vm126_vm0, %v535_v25 }
  0x2d   :  { %504 = vmatmul.msk.bf16.gmra.mxu0 %vm126_vm0, %v536_v26  ;;  %508 = vmatmul.msk.bf16.gmra.mxu1 %vm126_vm0, %v536_v26 }
  0x2e   :  { %512 = vmatmul.msk.bf16.gmra.mxu2 %vm126_vm0, %v536_v26 }
  0x2f   :  { %516 = vmatmul.msk.bf16.gmra.mxu3 %vm126_vm0, %v536_v26 }
  0x3d   :  { %505 = vmatmul.msk.bf16.gmra.mxu0 %vm126_vm0, %v537_v27  ;;  %509 = vmatmul.msk.bf16.gmra.mxu1 %vm126_vm0, %v537_v27 }
  0x3e   :  { %513 = vmatmul.msk.bf16.gmra.mxu2 %vm126_vm0, %v537_v27 }
  0x3f   :  { %517 = vmatmul.msk.bf16.gmra.mxu3 %vm126_vm0, %v537_v27 }
  0x4d   :  { %518 = vmatmul.msk.bf16.vlgmr.msrb.gmra.mxu0 %vm126_vm0, %v534_v11  ;;  %522 = vmatmul.msk.bf16.vlgmr.msrb.gmra.mxu1 %vm126_vm0, %v534_v11 }
  0x4e   :  { %526 = vmatmul.msk.bf16.vlgmr.msrb.gmra.mxu2 %vm126_vm0, %v534_v11 }
  0x4f   :  { %530 = vmatmul.msk.bf16.vlgmr.msrb.gmra.mxu3 %vm126_vm0, %v534_v11 }
  0x5d   :  { %519 = vmatmul.msk.bf16.gmra.mxu0 %vm126_vm0, %v535_v25  ;;  %523 = vmatmul.msk.bf16.gmra.mxu1 %vm126_vm0, %v535_v25 }
  0x5e   :  { %527 = vmatmul.msk.bf16.gmra.mxu2 %vm126_vm0, %v535_v25 }
  0x5f   :  { %531 = vmatmul.msk.bf16.gmra.mxu3 %vm126_vm0, %v535_v25 }
  0x6d   :  { %520 = vmatmul.msk.bf16.gmra.mxu0 %vm126_vm0, %v536_v26  ;;  %524 = vmatmul.msk.bf16.gmra.mxu1 %vm126_vm0, %v536_v26 }
  0x6e   :  { %528 = vmatmul.msk.bf16.gmra.mxu2 %vm126_vm0, %v536_v26 }
  0x6f   :  { %532 = vmatmul.msk.bf16.gmra.mxu3 %vm126_vm0, %v536_v26 }
  0x7d   :  { %521 = vmatmul.msk.bf16.gmra.mxu0 %vm126_vm0, %v537_v27  ;;  %525 = vmatmul.msk.bf16.gmra.mxu1 %vm126_vm0, %v537_v27 }
  0x7e   :  { %529 = vmatmul.msk.bf16.gmra.mxu2 %vm126_vm0, %v537_v27 }
  0x7f   :  { %533 = vmatmul.msk.bf16.gmra.mxu3 %vm126_vm0, %v537_v27 }
  0x8a   :  { %v148_v31 = vpop.f32.mrf.mxu0  ;;  %v177_v33 = vpop.f32.mrf.mxu1 }
  0x8b   :  { %v149_v32 = vadd.f32 %v148_v31, %v682_v29  ;;  %v178_v34 = vadd.f32 %v177_v33, %v685_v30 }
  0x8d   :  { %v371_v35 = vpack.c.bf16 %v178_v34, %v149_v32 }
  0x8f   :  { %403 = vst [vmem:[#allocation5] sm:$0xff] %v371_v35 }
  0x91   :  { %v206_v38 = vpop.f32.mrf.mxu2 }
  0x92   :  { %v207_v39 = vadd.f32 %v206_v38, %v690_v36  ;;  %v235_v40 = vpop.f32.mrf.mxu3  ;;  %v150_v41 = vpop.f32.mrf.mxu0 }
  0x93   :  { %v236_v42 = vadd.f32 %v235_v40, %v693_v37  ;;  %v151_v43 = vadd.f32 %v150_v41, %v682_v29  ;;  %v179_v44 = vpop.f32.mrf.mxu1 }
  0x94   :  { %v180_v45 = vadd.f32 %v179_v44, %v685_v30 }
  0x95   :  { %v372_v46 = vpack.c.bf16 %v236_v42, %v207_v39 }
  0x96   :  { %v375_v47 = vpack.c.bf16 %v180_v45, %v151_v43 }
  0x97   :  { %404 = vst [vmem:[#allocation5 + $0x8] sm:$0xff] %v372_v46 }
  0x98   :  { %407 = vst [vmem:[#allocation5 + $0x20] sm:$0xff] %v375_v47 }
  0x99   :  { %v208_v48 = vpop.f32.mrf.mxu2 }
  0x9a   :  { %v209_v49 = vadd.f32 %v208_v48, %v690_v36  ;;  %v237_v50 = vpop.f32.mrf.mxu3  ;;  %v153_v51 = vpop.f32.mrf.mxu0 }
  0x9b   :  { %v238_v52 = vadd.f32 %v237_v50, %v693_v37  ;;  %v154_v53 = vadd.f32 %v153_v51, %v682_v29  ;;  %v182_v54 = vpop.f32.mrf.mxu1  ;;  %v727_v50 = vperm.slane %v679_v28, 5 }
  0x9c   :  { %v183_v55 = vadd.f32 %v182_v54, %v685_v30 }
  0x9d   :  { %v376_v56 = vpack.c.bf16 %v238_v52, %v209_v49  ;;  %v724_v49 = vperm.slane %v679_v28, 4 }
  0x9e   :  { %v379_v57 = vpack.c.bf16 %v183_v55, %v154_v53 }
  0x9f   :  { %408 = vst [vmem:[#allocation5 + $0x28] sm:$0xff] %v376_v56 }
  0xa0   :  { %411 = vst [vmem:[#allocation5 + $0x40] sm:$0xff] %v379_v57 }
  0xa1   :  { %v211_v58 = vpop.f32.mrf.mxu2 }
  0xa2   :  { %v212_v59 = vadd.f32 %v211_v58, %v690_v36  ;;  %v240_v60 = vpop.f32.mrf.mxu3  ;;  %v155_v61 = vpop.f32.mrf.mxu0 }
  0xa3   :  { %v241_v62 = vadd.f32 %v240_v60, %v693_v37  ;;  %v156_v63 = vadd.f32 %v155_v61, %v682_v29  ;;  %v184_v0 = vpop.f32.mrf.mxu1  ;;  %v737_v60 = vperm.slane %v679_v28, 7 }
  0xa4   :  { %v185_v1 = vadd.f32 %v184_v0, %v685_v30 }
  0xa5   :  { %v380_v2 = vpack.c.bf16 %v241_v62, %v212_v59  ;;  %v734_v59 = vperm.slane %v679_v28, 6 }
  0xa6   :  { %v383_v3 = vpack.c.bf16 %v185_v1, %v156_v63 }
  0xa7   :  { %412 = vst [vmem:[#allocation5 + $0x48] sm:$0xff] %v380_v2 }
  0xa8   :  { %415 = vst [vmem:[#allocation5 + $0x60] sm:$0xff] %v383_v3 }
  0xa9   :  { %v213_v4 = vpop.f32.mrf.mxu2 }
  0xaa   :  { %v214_v5 = vadd.f32 %v213_v4, %v690_v36  ;;  %v242_v6 = vpop.f32.mrf.mxu3  ;;  %v158_v7 = vpop.f32.mrf.mxu0 }
  0xab   :  { %v243_v8 = vadd.f32 %v242_v6, %v693_v37  ;;  %v159_v9 = vadd.f32 %v158_v7, %v682_v29  ;;  %v187_v10 = vpop.f32.mrf.mxu1 }
  0xac   :  { %v188_v11 = vadd.f32 %v187_v10, %v685_v30 }
  0xad   :  { %v384_v12 = vpack.c.bf16 %v243_v8, %v214_v5 }
  0xae   :  { %v387_v13 = vpack.c.bf16 %v188_v11, %v159_v9 }
  0xaf   :  { %416 = vst [vmem:[#allocation5 + $0x68] sm:$0xff] %v384_v12 }
  0xb0   :  { %419 = vst [vmem:[#allocation5 + $0x80] sm:$0xff] %v387_v13 }
  0xb1   :  { %v216_v14 = vpop.f32.mrf.mxu2 }
  0xb2   :  { %v217_v15 = vadd.f32 %v216_v14, %v690_v36  ;;  %v245_v16 = vpop.f32.mrf.mxu3  ;;  %v160_v17 = vpop.f32.mrf.mxu0 }
  0xb3   :  { %v246_v18 = vadd.f32 %v245_v16, %v693_v37  ;;  %v161_v19 = vadd.f32 %v160_v17, %v682_v29  ;;  %v189_v20 = vpop.f32.mrf.mxu1 }
  0xb4   :  { %v190_v21 = vadd.f32 %v189_v20, %v685_v30 }
  0xb5   :  { %v388_v22 = vpack.c.bf16 %v246_v18, %v217_v15 }
  0xb6   :  { %v391_v23 = vpack.c.bf16 %v190_v21, %v161_v19 }
  0xb7   :  { %420 = vst [vmem:[#allocation5 + $0x88] sm:$0xff] %v388_v22 }
  0xb8   :  { %423 = vst [vmem:[#allocation5 + $0xa0] sm:$0xff] %v391_v23 }
  0xb9   :  { %v218_v24 = vpop.f32.mrf.mxu2 }
  0xba   :  { %v219_v25 = vadd.f32 %v218_v24, %v690_v36  ;;  %v247_v26 = vpop.f32.mrf.mxu3  ;;  %v163_v27 = vpop.f32.mrf.mxu0 }
  0xbb   :  { %v248_v31 = vadd.f32 %v247_v26, %v693_v37  ;;  %v164_v32 = vadd.f32 %v163_v27, %v682_v29  ;;  %v192_v33 = vpop.f32.mrf.mxu1 }
  0xbc   :  { %v193_v34 = vadd.f32 %v192_v33, %v685_v30 }
  0xbd   :  { %v392_v35 = vpack.c.bf16 %v248_v31, %v219_v25 }
  0xbe   :  { %v395_v38 = vpack.c.bf16 %v193_v34, %v164_v32 }
  0xbf   :  { %424 = vst [vmem:[#allocation5 + $0xa8] sm:$0xff] %v392_v35 }
  0xc0   :  { %427 = vst [vmem:[#allocation5 + $0xc0] sm:$0xff] %v395_v38 }
  0xc1   :  { %v221_v39 = vpop.f32.mrf.mxu2 }
  0xc2   :  { %v222_v40 = vadd.f32 %v221_v39, %v690_v36  ;;  %v250_v41 = vpop.f32.mrf.mxu3  ;;  %v165_v42 = vpop.f32.mrf.mxu0 }
  0xc3   :  { %v251_v43 = vadd.f32 %v250_v41, %v693_v37  ;;  %v166_v44 = vadd.f32 %v165_v42, %v682_v29  ;;  %v194_v45 = vpop.f32.mrf.mxu1 }
  0xc4   :  { %v195_v46 = vadd.f32 %v194_v45, %v685_v30 }
  0xc5   :  { %v396_v47 = vpack.c.bf16 %v251_v43, %v222_v40 }
  0xc6   :  { %v399_v48 = vpack.c.bf16 %v195_v46, %v166_v44 }
  0xc7   :  { %428 = vst [vmem:[#allocation5 + $0xc8] sm:$0xff] %v396_v47 }
  0xc8   :  { %431 = vst [vmem:[#allocation5 + $0xe0] sm:$0xff] %v399_v48 }
  0xc9   :  { %v223_v51 = vpop.f32.mrf.mxu2 }
  0xca   :  { %v224_v52 = vadd.f32 %v223_v51, %v690_v36  ;;  %v252_v53 = vpop.f32.mrf.mxu3  ;;  %v264_v54 = vpop.f32.mrf.mxu0 }
  0xcb   :  { %v253_v29 = vadd.f32 %v252_v53, %v693_v37  ;;  %v265_v55 = vadd.f32 %v264_v54, %v724_v49  ;;  %v293_v30 = vpop.f32.mrf.mxu1 }
  0xcc   :  { %v294_v56 = vadd.f32 %v293_v30, %v727_v50 }
  0xcd   :  { %v400_v57 = vpack.c.bf16 %v253_v29, %v224_v52 }
  0xce   :  { %v373_v58 = vpack.c.bf16 %v294_v56, %v265_v55 }
  0xcf   :  { %432 = vst [vmem:[#allocation5 + $0xe8] sm:$0xff] %v400_v57 }
  0xd0   :  { %405 = vst [vmem:[#allocation5 + $0x10] sm:$0xff] %v373_v58 }
  0xd1   :  { %v322_v36 = vpop.f32.mrf.mxu2 }
  0xd2   :  { %v323_v61 = vadd.f32 %v322_v36, %v734_v59  ;;  %v351_v62 = vpop.f32.mrf.mxu3  ;;  %v266_v37 = vpop.f32.mrf.mxu0 }
  0xd3   :  { %v352_v63 = vadd.f32 %v351_v62, %v737_v60  ;;  %v267_v0 = vadd.f32 %v266_v37, %v724_v49  ;;  %v295_v1 = vpop.f32.mrf.mxu1 }
  0xd4   :  { %v296_v2 = vadd.f32 %v295_v1, %v727_v50 }
  0xd5   :  { %v374_v3 = vpack.c.bf16 %v352_v63, %v323_v61 }
  0xd6   :  { %v377_v4 = vpack.c.bf16 %v296_v2, %v267_v0 }
  0xd7   :  { %406 = vst [vmem:[#allocation5 + $0x18] sm:$0xff] %v374_v3 }
  0xd8   :  { %409 = vst [vmem:[#allocation5 + $0x30] sm:$0xff] %v377_v4 }
  0xd9   :  { %v324_v5 = vpop.f32.mrf.mxu2 }
  0xda   :  { %v325_v28 = vadd.f32 %v324_v5, %v734_v59  ;;  %v353_v6 = vpop.f32.mrf.mxu3  ;;  %v269_v7 = vpop.f32.mrf.mxu0 }
  0xdb   :  { %v354_v8 = vadd.f32 %v353_v6, %v737_v60  ;;  %v270_v9 = vadd.f32 %v269_v7, %v724_v49  ;;  %v298_v10 = vpop.f32.mrf.mxu1 }
  0xdc   :  { %v299_v11 = vadd.f32 %v298_v10, %v727_v50 }
  0xdd   :  { %v378_v12 = vpack.c.bf16 %v354_v8, %v325_v28 }
  0xde   :  { %v381_v13 = vpack.c.bf16 %v299_v11, %v270_v9 }
  0xdf   :  { %410 = vst [vmem:[#allocation5 + $0x38] sm:$0xff] %v378_v12 }
  0xe0   :  { %413 = vst [vmem:[#allocation5 + $0x50] sm:$0xff] %v381_v13 }
  0xe1   :  { %v327_v14 = vpop.f32.mrf.mxu2 }
  0xe2   :  { %v328_v15 = vadd.f32 %v327_v14, %v734_v59  ;;  %v356_v16 = vpop.f32.mrf.mxu3  ;;  %v271_v17 = vpop.f32.mrf.mxu0 }
  0xe3   :  { %v357_v18 = vadd.f32 %v356_v16, %v737_v60  ;;  %v272_v19 = vadd.f32 %v271_v17, %v724_v49  ;;  %v300_v20 = vpop.f32.mrf.mxu1 }
  0xe4   :  { %v301_v21 = vadd.f32 %v300_v20, %v727_v50 }
  0xe5   :  { %v382_v22 = vpack.c.bf16 %v357_v18, %v328_v15 }
  0xe6   :  { %v385_v23 = vpack.c.bf16 %v301_v21, %v272_v19 }
  0xe7   :  { %414 = vst [vmem:[#allocation5 + $0x58] sm:$0xff] %v382_v22 }
  0xe8   :  { %417 = vst [vmem:[#allocation5 + $0x70] sm:$0xff] %v385_v23 }
  0xe9   :  { %v329_v24 = vpop.f32.mrf.mxu2 }
  0xea   :  { %v330_v25 = vadd.f32 %v329_v24, %v734_v59  ;;  %v358_v26 = vpop.f32.mrf.mxu3  ;;  %v274_v27 = vpop.f32.mrf.mxu0 }
  0xeb   :  { %v359_v31 = vadd.f32 %v358_v26, %v737_v60  ;;  %v275_v32 = vadd.f32 %v274_v27, %v724_v49  ;;  %v303_v33 = vpop.f32.mrf.mxu1 }
  0xec   :  { %v304_v34 = vadd.f32 %v303_v33, %v727_v50 }
  0xed   :  { %v386_v35 = vpack.c.bf16 %v359_v31, %v330_v25 }
  0xee   :  { %v389_v38 = vpack.c.bf16 %v304_v34, %v275_v32 }
  0xef   :  { %418 = vst [vmem:[#allocation5 + $0x78] sm:$0xff] %v386_v35 }
  0xf0   :  { %421 = vst [vmem:[#allocation5 + $0x90] sm:$0xff] %v389_v38 }
  0xf1   :  { %v332_v39 = vpop.f32.mrf.mxu2 }
  0xf2   :  { %v333_v40 = vadd.f32 %v332_v39, %v734_v59  ;;  %v361_v41 = vpop.f32.mrf.mxu3  ;;  %v276_v42 = vpop.f32.mrf.mxu0 }
  0xf3   :  { %v362_v43 = vadd.f32 %v361_v41, %v737_v60  ;;  %v277_v44 = vadd.f32 %v276_v42, %v724_v49  ;;  %v305_v45 = vpop.f32.mrf.mxu1 }
  0xf4   :  { %v306_v46 = vadd.f32 %v305_v45, %v727_v50 }
  0xf5   :  { %v390_v47 = vpack.c.bf16 %v362_v43, %v333_v40 }
  0xf6   :  { %v393_v48 = vpack.c.bf16 %v306_v46, %v277_v44 }
  0xf7   :  { %422 = vst [vmem:[#allocation5 + $0x98] sm:$0xff] %v390_v47 }
  0xf8   :  { %425 = vst [vmem:[#allocation5 + $0xb0] sm:$0xff] %v393_v48 }
  0xf9   :  { %v334_v51 = vpop.f32.mrf.mxu2 }
  0xfa   :  { %v335_v52 = vadd.f32 %v334_v51, %v734_v59  ;;  %v363_v53 = vpop.f32.mrf.mxu3  ;;  %v279_v54 = vpop.f32.mrf.mxu0 }
  0xfb   :  { %v364_v29 = vadd.f32 %v363_v53, %v737_v60  ;;  %v280_v55 = vadd.f32 %v279_v54, %v724_v49  ;;  %v308_v30 = vpop.f32.mrf.mxu1 }
  0xfc   :  { %v309_v56 = vadd.f32 %v308_v30, %v727_v50 }
  0xfd   :  { %v394_v57 = vpack.c.bf16 %v364_v29, %v335_v52 }
  0xfe   :  { %v397_v58 = vpack.c.bf16 %v309_v56, %v280_v55 }
  0xff   :  { %426 = vst [vmem:[#allocation5 + $0xb8] sm:$0xff] %v394_v57 }
 0x100   :  { %429 = vst [vmem:[#allocation5 + $0xd0] sm:$0xff] %v397_v58 }
 0x101   :  { %v337_v36 = vpop.f32.mrf.mxu2 }
 0x102   :  { %v338_v61 = vadd.f32 %v337_v36, %v734_v59  ;;  %v366_v62 = vpop.f32.mrf.mxu3  ;;  %v281_v37 = vpop.f32.mrf.mxu0 }
 0x103   :  { %v367_v63 = vadd.f32 %v366_v62, %v737_v60  ;;  %v282_v0 = vadd.f32 %v281_v37, %v724_v49  ;;  %v310_v1 = vpop.f32.mrf.mxu1 }
 0x104   :  { %v311_v2 = vadd.f32 %v310_v1, %v727_v50 }
 0x105   :  { %v398_v3 = vpack.c.bf16 %v367_v63, %v338_v61 }
 0x106   :  { %v401_v4 = vpack.c.bf16 %v311_v2, %v282_v0 }
 0x107   :  { %430 = vst [vmem:[#allocation5 + $0xd8] sm:$0xff] %v398_v3 }
 0x108   :  { %433 = vst [vmem:[#allocation5 + $0xf0] sm:$0xff] %v401_v4 }
 0x109   :  { %v339_v5 = vpop.f32.mrf.mxu2 }
 0x10a   :  { %v340_v28 = vadd.f32 %v339_v5, %v734_v59  ;;  %v368_v6 = vpop.f32.mrf.mxu3 }
 0x10b   :  { %v369_v7 = vadd.f32 %v368_v6, %v737_v60 }
 0x10d   :  { %v402_v49 = vpack.c.bf16 %v369_v7, %v340_v28 }
 0x10f   :  { %434 = vst [vmem:[#allocation5 + $0xf8] sm:$0xff] %v402_v49 }
 0x110   :  { %447 = dma.vmem_to_hbm [thread:$0]  %s440_s27, 4096, %s442_s30, [#allocation4], %s603_s17, %s603_s17, %s604_s18  }
 0x111   :  { %600 = dma.done.wait [#allocation4], 4096  }
 0x112   :  { %601 = vsyncadd [#allocation4], 4294963200 }
 0x113   :  { %452 = vsyncpa [#allocation3], 1 }
 0x114   :  { %453 = vsyncpa [#allocation4], 1 }

</bundles_post_ra>
